<compile_context>
chip_gen: v7x
topology: tpu7x:2x2x1
jax: 0.10.0
libtpu: 0.0.40
codegen_flags: <defaults>
</compile_context>

<pallas_src>
import functools

import jax
import jax.numpy as jnp
from jax.experimental import pallas as pl
from jax.experimental.pallas import tpu as pltpu

LANE = 128  # TPU lane width; mean / log_std head halves are each padded to this


def _round_up(x, m):
    return (x + m - 1) // m * m


def _cdiv(a, b):
    return -(-a // b)


def _choose_bt(B, block_b):
    """Pick a batch tile (multiple of 8) that minimizes tail padding and keeps
    the grid >= 2 steps for mid/large B (v7x has two TensorCores)."""
    pB8 = _round_up(B, 8)
    if pB8 <= 16:
        return pB8                      # too small to split
    if pB8 <= block_b:
        return _round_up(_cdiv(pB8, 2), 8)          # 2 tiles, both TCs busy
    n_tiles = _cdiv(pB8, block_b)
    return _round_up(_cdiv(pB8, n_tiles), 8)        # big tiles, minimal tail


# ----------------------------------------------------------------------------
# Kernels
# ----------------------------------------------------------------------------
def _trunk(obs_ref, w0_ref, b0_ref, w1_ref, b1_ref, w2_ref, b2_ref):
    """Mlp.forward: relu(Linear) x2 + fused last Linear producing (mean|log_std).

    Matmuls run bf16 x bf16 -> f32 on the MXU; bias/ReLU/clip in f32 (VPU).
    """
    bf16, f32 = jnp.bfloat16, jnp.float32
    h = jnp.dot(obs_ref[...].astype(bf16), w0_ref[...], preferred_element_type=f32)
    h = jnp.maximum(h + b0_ref[...], 0.0)
    h = jnp.dot(h.astype(bf16), w1_ref[...], preferred_element_type=f32)
    h = jnp.maximum(h + b1_ref[...], 0.0)
    # Fused head: one matmul -> [bt, 2*LANE]; cols [0:LANE) hold mean (real
    # values in [0:A)), cols [LANE:2*LANE) hold log_std.  Padding columns have
    # zero weight/bias so they stay exactly 0.
    head = jnp.dot(h.astype(bf16), w2_ref[...], preferred_element_type=f32) + b2_ref[...]
    mean = head[:, :LANE]
    log_std = jnp.clip(head[:, LANE:], -20.0, 2.0)
    return mean, log_std


def _actor_train_kernel(action_dim,
                        obs_ref, eps_ref,
                        w0_ref, b0_ref, w1_ref, b1_ref, w2_ref, b2_ref,
                        out_ref):
    mean, log_std = _trunk(obs_ref, w0_ref, b0_ref, w1_ref, b1_ref, w2_ref, b2_ref)
    std = jnp.exp(log_std)
    eps = eps_ref[...]                     # zero-padded beyond action_dim
    pre = mean + std * eps                 # pre-tanh sample
    action = jnp.tanh(pre)

    # Normal(mean, std).log_prob(pre):  pre - mean == std * eps exactly.
    normal_lp = -0.5 * eps * eps - log_std - 0.5 * jnp.log(2.0 * jnp.pi)
    # tanh-Jacobian: 2*log2 + logsigmoid(2*pre) + logsigmoid(-2*pre)
    #              = 2*(log2 - pre - softplus(-2*pre)); stable softplus.
    z = -2.0 * pre
    softplus_z = jnp.maximum(z, 0.0) + jnp.log1p(jnp.exp(-jnp.abs(z)))
    log_det = 2.0 * (jnp.log(2.0) - pre - softplus_z)
    lp = normal_lp - log_det

    lane = jax.lax.broadcasted_iota(jnp.int32, lp.shape, 1)
    lp = jnp.where(lane < action_dim, lp, 0.0)          # sum only real lanes
    logp = jnp.sum(lp, axis=1, keepdims=True)

    # Single lane-dense 128-lane slab: action in [0:A), logp broadcast in [A:128).
    out_ref[...] = jnp.where(lane < action_dim, action,
                             jnp.broadcast_to(logp, action.shape))


def _actor_eval_kernel(obs_ref,
                       w0_ref, b0_ref, w1_ref, b1_ref, w2_ref, b2_ref,
                       out_ref):
    mean, _ = _trunk(obs_ref, w0_ref, b0_ref, w1_ref, b1_ref, w2_ref, b2_ref)
    out_ref[...] = jnp.tanh(mean)


# ----------------------------------------------------------------------------
# Host-side wrappers
# ----------------------------------------------------------------------------
def prepare_actor_params(params):
    """One-time prep (call once, outside the hot path): pack the fused head
    weight into 2*128 lanes and cast matmul weights to bf16."""
    H = params["w0"].shape[1]
    A = params["w2"].shape[1] // 2
    assert A < LANE

    w2, b2 = params["w2"], params["b2"]
    w2p = jnp.zeros((H, 2 * LANE), jnp.float32)
    w2p = w2p.at[:, :A].set(w2[:, :A]).at[:, LANE:LANE + A].set(w2[:, A:])
    b2p = jnp.zeros((1, 2 * LANE), jnp.float32)
    b2p = b2p.at[:, :A].set(b2[:, :A]).at[:, LANE:LANE + A].set(b2[:, A:])

    bf16 = jnp.bfloat16
    return {
        "w0": params["w0"].astype(bf16), "b0": params["b0"],
        "w1": params["w1"].astype(bf16), "b1": params["b1"],
        "w2p": w2p.astype(bf16), "b2p": b2p,
        "S": params["w0"].shape[0], "H": H, "A": A,
    }


def actor_forward(obs, eps, prep, *, training=True, block_b=1024):
    """obs: [B, state_dim] f32; eps: [B, action_dim] f32 N(0,1) noise (ignored in eval).
    `prep` = prepare_actor_params(params)."""
    B, S = obs.shape
    H, A = prep["H"], prep["A"]
    assert S == prep["S"]

    bt = _choose_bt(B, block_b)
    pB = _round_up(B, bt)
    grid = (pB // bt,)
    obs_p = jnp.pad(obs, ((0, pB - B), (0, 0)))

    weight_specs = [
        pl.BlockSpec((S, H), lambda i: (0, 0)),          # weights: constant index_map,
        pl.BlockSpec((1, H), lambda i: (0, 0)),          # resident across batch tiles
        pl.BlockSpec((H, H), lambda i: (0, 0)),
        pl.BlockSpec((1, H), lambda i: (0, 0)),
        pl.BlockSpec((H, 2 * LANE), lambda i: (0, 0)),
        pl.BlockSpec((1, 2 * LANE), lambda i: (0, 0)),
    ]
    weight_args = (prep["w0"], prep["b0"], prep["w1"], prep["b1"],
                   prep["w2p"], prep["b2p"])
    compiler_params = pltpu.CompilerParams(
        dimension_semantics=("parallel",),               # shard batch tiles over TCs
        vmem_limit_bytes=32 * 1024 * 1024,               # safe on v7x's 64 MiB VMEM
    )

    if training:
        eps_p = jnp.pad(eps, ((0, pB - B), (0, LANE - A)))
        out = pl.pallas_call(
            functools.partial(_actor_train_kernel, A),
            out_shape=jax.ShapeDtypeStruct((pB, LANE), jnp.float32),
            grid=grid,
            in_specs=[pl.BlockSpec((bt, S), lambda i: (i, 0)),
                      pl.BlockSpec((bt, LANE), lambda i: (i, 0))] + weight_specs,
            out_specs=pl.BlockSpec((bt, LANE), lambda i: (i, 0)),
            compiler_params=compiler_params,
        )(obs_p, eps_p, *weight_args)
        return out[:B, :A], out[:B, A:A + 1]

    # eval variant: no eps input, no log_prob output stream.
    out = pl.pallas_call(
        _actor_eval_kernel,
        out_shape=jax.ShapeDtypeStruct((pB, LANE), jnp.float32),
        grid=grid,
        in_specs=[pl.BlockSpec((bt, S), lambda i: (i, 0))] + weight_specs,
        out_specs=pl.BlockSpec((bt, LANE), lambda i: (i, 0)),
        compiler_params=compiler_params,
    )(obs_p, *weight_args)
    return out[:B, :A], None


# ----------------------------------------------------------------------------
# Init + reference
# ----------------------------------------------------------------------------
def init_actor_params(key, state_dim, action_dim, hidden=256):
    """PyTorch-Linear-like uniform(+-1/sqrt(fan_in)) init; last layer outputs 2*A."""
    ks = jax.random.split(key, 6)

    def lin(kw, kb, fan_in, fan_out):
        bound = 1.0 / jnp.sqrt(float(fan_in))
        w = jax.random.uniform(kw, (fan_in, fan_out), jnp.float32, -bound, bound)
        b = jax.random.uniform(kb, (1, fan_out), jnp.float32, -bound, bound)
        return w, b

    w0, b0 = lin(ks[0], ks[1], state_dim, hidden)
    w1, b1 = lin(ks[2], ks[3], hidden, hidden)
    w2, b2 = lin(ks[4], ks[5], hidden, 2 * action_dim)
    return {"w0": w0, "b0": b0, "w1": w1, "b1": b1, "w2": w2, "b2": b2}


def _reference_forward(obs, eps, p, training=True, bf16_matmul=True):
    """Pure-JAX reference; bf16_matmul mirrors the kernel's MXU dtype."""
    def mm(x, w):
        if bf16_matmul:
            return jnp.dot(x.astype(jnp.bfloat16), w.astype(jnp.bfloat16),
                           preferred_element_type=jnp.float32)
        return jnp.dot(x, w)

    A = p["w2"].shape[1] // 2
    h = jax.nn.relu(mm(obs, p["w0"]) + p["b0"])
    h = jax.nn.relu(mm(h, p["w1"]) + p["b1"])
    out = mm(h, p["w2"]) + p["b2"]                       # == Mlp.forward output
    mean, log_std = out[:, :A], jnp.clip(out[:, A:], -20.0, 2.0)
    if not training:
        return jnp.tanh(mean), None
    std = jnp.exp(log_std)
    pre = mean + std * eps
    action = jnp.tanh(pre)
    normal_lp = -((pre - mean) ** 2) / (2.0 * std * std) - log_std - 0.5 * jnp.log(2.0 * jnp.pi)
    log_det = 2.0 * jnp.log(2.0) + jax.nn.log_sigmoid(2.0 * pre) + jax.nn.log_sigmoid(-2.0 * pre)
    return action, jnp.sum(normal_lp - log_det, axis=1, keepdims=True)


if __name__ == "__main__":
    B, STATE_DIM, ACTION_DIM, HIDDEN = 8, 32, 8, 256

    key = jax.random.PRNGKey(0)
    k_params, k_obs, k_eps = jax.random.split(key, 3)
    params = init_actor_params(k_params, STATE_DIM, ACTION_DIM, HIDDEN)
    prep = prepare_actor_params(params)          # one-time, out of the hot path
    obs = jax.random.normal(k_obs, (B, STATE_DIM), jnp.float32)
    eps = jax.random.normal(k_eps, (B, ACTION_DIM), jnp.float32)

    # training mode (small batch, single tile)
    action, log_prob = actor_forward(obs, eps, prep, training=True)
    action = jax.block_until_ready(action)
    log_prob = jax.block_until_ready(log_prob)

    ref_a, ref_lp = _reference_forward(obs, eps, params, training=True, bf16_matmul=True)
    assert jnp.allclose(action, ref_a, atol=5e-3, rtol=5e-3)
    assert jnp.allclose(log_prob, ref_lp, atol=5e-2, rtol=5e-2)

    f32_a, f32_lp = _reference_forward(obs, eps, params, training=True, bf16_matmul=False)
    assert jnp.allclose(action, f32_a, atol=5e-2, rtol=5e-2)
    assert jnp.allclose(log_prob, f32_lp, atol=3e-1, rtol=1e-1)

    # eval mode: action = tanh(mean), no log_prob output compiled
    eval_action, eval_lp = actor_forward(obs, None, prep, training=False)
    jax.block_until_ready(eval_action)
    assert eval_lp is None
    ref_eval_a, _ = _reference_forward(obs, eps, params, training=False, bf16_matmul=True)
    assert jnp.allclose(eval_action, ref_eval_a, atol=5e-3, rtol=5e-3)

    # mid-size batch: split into 2 tiles of 104 (both v7x TCs, minimal padding)
    B2 = 200
    k_o2, k_e2 = jax.random.split(jax.random.PRNGKey(1), 2)
    obs2 = jax.random.normal(k_o2, (B2, STATE_DIM), jnp.float32)
    eps2 = jax.random.normal(k_e2, (B2, ACTION_DIM), jnp.float32)
    a2, lp2 = actor_forward(obs2, eps2, prep, training=True)
    a2 = jax.block_until_ready(a2)
    r_a2, r_lp2 = _reference_forward(obs2, eps2, params, training=True, bf16_matmul=True)
    assert jnp.allclose(a2, r_a2, atol=5e-3, rtol=5e-3)
    assert jnp.allclose(lp2, r_lp2, atol=5e-2, rtol=5e-2)

    # large batch with big tiles (block_b=512 -> 2 tiles of 504 for B=1000)
    B3 = 1000
    k_o3, k_e3 = jax.random.split(jax.random.PRNGKey(2), 2)
    obs3 = jax.random.normal(k_o3, (B3, STATE_DIM), jnp.float32)
    eps3 = jax.random.normal(k_e3, (B3, ACTION_DIM), jnp.float32)
    a3, lp3 = actor_forward(obs3, eps3, prep, training=True, block_b=512)
    a3 = jax.block_until_ready(a3)
    r_a3, r_lp3 = _reference_forward(obs3, eps3, params, training=True, bf16_matmul=True)
    assert jnp.allclose(a3, r_a3, atol=5e-3, rtol=5e-3)
    assert jnp.allclose(lp3, r_lp3, atol=5e-2, rtol=5e-2)

    print("KERNEL_OK")
</pallas_src>

<mosaic_0001>
module attributes {stable_mosaic.version = 11 : i64} {
  func.func @_actor_train_kernel(%arg0: i32, %arg1: memref<8x32xf32, #tpu.memory_space<vmem>>, %arg2: memref<8x128xf32, #tpu.memory_space<vmem>>, %arg3: memref<32x256xbf16, #tpu.memory_space<vmem>>, %arg4: memref<1x256xf32, #tpu.memory_space<vmem>>, %arg5: memref<256x256xbf16, #tpu.memory_space<vmem>>, %arg6: memref<1x256xf32, #tpu.memory_space<vmem>>, %arg7: memref<256x256xbf16, #tpu.memory_space<vmem>>, %arg8: memref<1x256xf32, #tpu.memory_space<vmem>>, %arg9: memref<8x128xf32, #tpu.memory_space<vmem>>) attributes {dimension_semantics = [#tpu.dimension_semantics<parallel>], iteration_bounds = array<i64: 1>, scalar_prefetch = 0 : i64, scratch_operands = 0 : i64, tpu.core_type = #tpu.core_type<tc>, window_params = [{transform_indices = @transform_0, window_bounds = array<i64: 8, 32>}, {transform_indices = @transform_1, window_bounds = array<i64: 8, 128>}, {pipeline_mode = #tpu.pipeline_mode<synchronous>, transform_indices = @transform_2, window_bounds = array<i64: 32, 256>}, {pipeline_mode = #tpu.pipeline_mode<synchronous>, transform_indices = @transform_3, window_bounds = array<i64: 1, 256>}, {pipeline_mode = #tpu.pipeline_mode<synchronous>, transform_indices = @transform_4, window_bounds = array<i64: 256, 256>}, {pipeline_mode = #tpu.pipeline_mode<synchronous>, transform_indices = @transform_5, window_bounds = array<i64: 1, 256>}, {pipeline_mode = #tpu.pipeline_mode<synchronous>, transform_indices = @transform_6, window_bounds = array<i64: 256, 256>}, {pipeline_mode = #tpu.pipeline_mode<synchronous>, transform_indices = @transform_7, window_bounds = array<i64: 1, 256>}, {transform_indices = @transform_8, window_bounds = array<i64: 8, 128>}]} {
    %c0 = arith.constant 0 : index
    %c0_0 = arith.constant 0 : index
    %0 = vector.load %arg1[%c0, %c0_0] : memref<8x32xf32, #tpu.memory_space<vmem>>, vector<8x32xf32>
    %1 = arith.truncf %0 : vector<8x32xf32> to vector<8x32xbf16>
    %c0_1 = arith.constant 0 : index
    %c0_2 = arith.constant 0 : index
    %2 = vector.load %arg3[%c0_1, %c0_2] : memref<32x256xbf16, #tpu.memory_space<vmem>>, vector<32x256xbf16>
    %cst = arith.constant dense<0.000000e+00> : vector<8x256xf32>
    %3 = tpu.matmul %1, %2, %cst {dimension_numbers = #tpu.dot_dimension_numbers<[1], [0], [0], [1], [0, 0, 1, 1], [], []>} : vector<8x32xbf16>, vector<32x256xbf16>, vector<8x256xf32> -> vector<8x256xf32>
    %c0_3 = arith.constant 0 : index
    %c0_4 = arith.constant 0 : index
    %4 = vector.load %arg4[%c0_3, %c0_4] : memref<1x256xf32, #tpu.memory_space<vmem>>, vector<1x256xf32>
    %5 = vector.broadcast %4 : vector<1x256xf32> to vector<8x256xf32>
    %6 = arith.addf %3, %5 : vector<8x256xf32>
    %cst_5 = arith.constant 0.000000e+00 : f32
    %7 = vector.broadcast %cst_5 : f32 to vector<8x256xf32>
    %8 = arith.maximumf %6, %7 : vector<8x256xf32>
    %9 = arith.truncf %8 : vector<8x256xf32> to vector<8x256xbf16>
    %c0_6 = arith.constant 0 : index
    %c0_7 = arith.constant 0 : index
    %10 = vector.load %arg5[%c0_6, %c0_7] : memref<256x256xbf16, #tpu.memory_space<vmem>>, vector<256x256xbf16>
    %cst_8 = arith.constant dense<0.000000e+00> : vector<8x256xf32>
    %11 = tpu.matmul %9, %10, %cst_8 {dimension_numbers = #tpu.dot_dimension_numbers<[1], [0], [0], [1], [0, 0, 1, 1], [], []>} : vector<8x256xbf16>, vector<256x256xbf16>, vector<8x256xf32> -> vector<8x256xf32>
    %c0_9 = arith.constant 0 : index
    %c0_10 = arith.constant 0 : index
    %12 = vector.load %arg6[%c0_9, %c0_10] : memref<1x256xf32, #tpu.memory_space<vmem>>, vector<1x256xf32>
    %13 = vector.broadcast %12 : vector<1x256xf32> to vector<8x256xf32>
    %14 = arith.addf %11, %13 : vector<8x256xf32>
    %cst_11 = arith.constant 0.000000e+00 : f32
    %15 = vector.broadcast %cst_11 : f32 to vector<8x256xf32>
    %16 = arith.maximumf %14, %15 : vector<8x256xf32>
    %17 = arith.truncf %16 : vector<8x256xf32> to vector<8x256xbf16>
    %c0_12 = arith.constant 0 : index
    %c0_13 = arith.constant 0 : index
    %18 = vector.load %arg7[%c0_12, %c0_13] : memref<256x256xbf16, #tpu.memory_space<vmem>>, vector<256x256xbf16>
    %cst_14 = arith.constant dense<0.000000e+00> : vector<8x256xf32>
    %19 = tpu.matmul %17, %18, %cst_14 {dimension_numbers = #tpu.dot_dimension_numbers<[1], [0], [0], [1], [0, 0, 1, 1], [], []>} : vector<8x256xbf16>, vector<256x256xbf16>, vector<8x256xf32> -> vector<8x256xf32>
    %c0_15 = arith.constant 0 : index
    %c0_16 = arith.constant 0 : index
    %20 = vector.load %arg8[%c0_15, %c0_16] : memref<1x256xf32, #tpu.memory_space<vmem>>, vector<1x256xf32>
    %21 = vector.broadcast %20 : vector<1x256xf32> to vector<8x256xf32>
    %22 = arith.addf %19, %21 : vector<8x256xf32>
    %23 = vector.extract_strided_slice %22 {offsets = [0, 0], sizes = [8, 128], strides = [1, 1]} : vector<8x256xf32> to vector<8x128xf32>
    %24 = vector.extract_strided_slice %22 {offsets = [0, 128], sizes = [8, 128], strides = [1, 1]} : vector<8x256xf32> to vector<8x128xf32>
    %cst_17 = arith.constant -2.000000e+01 : f32
    %cst_18 = arith.constant 2.000000e+00 : f32
    %25 = vector.broadcast %cst_17 : f32 to vector<8x128xf32>
    %26 = arith.maximumf %25, %24 : vector<8x128xf32>
    %27 = vector.broadcast %cst_18 : f32 to vector<8x128xf32>
    %28 = arith.minimumf %27, %26 : vector<8x128xf32>
    %29 = math.exp %28 : vector<8x128xf32>
    %c0_19 = arith.constant 0 : index
    %c0_20 = arith.constant 0 : index
    %30 = vector.load %arg2[%c0_19, %c0_20] : memref<8x128xf32, #tpu.memory_space<vmem>>, vector<8x128xf32>
    %31 = arith.mulf %29, %30 : vector<8x128xf32>
    %32 = arith.addf %23, %31 : vector<8x128xf32>
    %33 = math.tanh %32 : vector<8x128xf32>
    %cst_21 = arith.constant -5.000000e-01 : f32
    %34 = vector.broadcast %cst_21 : f32 to vector<8x128xf32>
    %35 = arith.mulf %34, %30 : vector<8x128xf32>
    %36 = arith.mulf %35, %30 : vector<8x128xf32>
    %37 = arith.subf %36, %28 : vector<8x128xf32>
    %cst_22 = arith.constant 6.28318548 : f32
    %38 = math.log %cst_22 : f32
    %cst_23 = arith.constant 5.000000e-01 : f32
    %39 = arith.mulf %cst_23, %38 : f32
    %40 = vector.broadcast %39 : f32 to vector<8x128xf32>
    %41 = arith.subf %37, %40 : vector<8x128xf32>
    %cst_24 = arith.constant -2.000000e+00 : f32
    %42 = vector.broadcast %cst_24 : f32 to vector<8x128xf32>
    %43 = arith.mulf %42, %32 : vector<8x128xf32>
    %cst_25 = arith.constant 0.000000e+00 : f32
    %44 = vector.broadcast %cst_25 : f32 to vector<8x128xf32>
    %45 = arith.maximumf %43, %44 : vector<8x128xf32>
    %46 = math.absf %43 : vector<8x128xf32>
    %cst_26 = arith.constant 0.000000e+00 : f32
    %47 = vector.broadcast %cst_26 : f32 to vector<8x128xf32>
    %48 = arith.subf %47, %46 : vector<8x128xf32>
    %49 = math.exp %48 : vector<8x128xf32>
    %50 = math.log1p %49 : vector<8x128xf32>
    %51 = arith.addf %45, %50 : vector<8x128xf32>
    %cst_27 = arith.constant 2.000000e+00 : f32
    %52 = math.log %cst_27 : f32
    %53 = vector.broadcast %52 : f32 to vector<8x128xf32>
    %54 = arith.subf %53, %32 : vector<8x128xf32>
    %55 = arith.subf %54, %51 : vector<8x128xf32>
    %cst_28 = arith.constant 2.000000e+00 : f32
    %56 = vector.broadcast %cst_28 : f32 to vector<8x128xf32>
    %57 = arith.mulf %56, %55 : vector<8x128xf32>
    %58 = arith.subf %41, %57 : vector<8x128xf32>
    %59 = tpu.iota {dimensions = array<i32: 1>} : vector<8x128xi32>
    %c8_i32 = arith.constant 8 : i32
    %60 = vector.broadcast %c8_i32 : i32 to vector<8x128xi32>
    %61 = arith.cmpi slt, %59, %60 : vector<8x128xi32>
    %cst_29 = arith.constant 0.000000e+00 : f32
    %62 = vector.broadcast %cst_29 : f32 to vector<8x128xf32>
    %63 = arith.select %61, %58, %62 : vector<8x128xi1>, vector<8x128xf32>
    %cst_30 = arith.constant dense<0.000000e+00> : vector<8xf32>
    %64 = vector.multi_reduction <add>, %63, %cst_30 [1] : vector<8x128xf32> to vector<8xf32>
    %65 = vector.shape_cast %64 : vector<8xf32> to vector<8x1xf32>
    %c8_i32_31 = arith.constant 8 : i32
    %66 = vector.broadcast %c8_i32_31 : i32 to vector<8x128xi32>
    %67 = arith.cmpi slt, %59, %66 : vector<8x128xi32>
    %68 = vector.shape_cast %65 : vector<8x1xf32> to vector<8x1xf32>
    %69 = vector.broadcast %68 : vector<8x1xf32> to vector<8x128xf32>
    %70 = arith.select %67, %33, %69 : vector<8x128xi1>, vector<8x128xf32>
    %c0_32 = arith.constant 0 : index
    %c0_33 = arith.constant 0 : index
    %71 = vector.load %arg9[%c0_32, %c0_33] : memref<8x128xf32, #tpu.memory_space<vmem>>, vector<8x128xf32>
    tpu.vector_store %arg9[%c0_32, %c0_33], %70 {strides = array<i32>} : memref<8x128xf32, #tpu.memory_space<vmem>>, vector<8x128xf32>,
    return
  }
  func.func @transform_0(%arg0: i32) -> (i32, i32) {
    %c0_i32 = arith.constant 0 : i32
    %c0_i32_0 = arith.constant 0 : i32
    return %arg0, %c0_i32 : i32, i32
  }
  func.func @transform_1(%arg0: i32) -> (i32, i32) {
    %c0_i32 = arith.constant 0 : i32
    %c0_i32_0 = arith.constant 0 : i32
    return %arg0, %c0_i32 : i32, i32
  }
  func.func @transform_2(%arg0: i32) -> (i32, i32) {
    %c0_i32 = arith.constant 0 : i32
    %c0_i32_0 = arith.constant 0 : i32
    %c0_i32_1 = arith.constant 0 : i32
    return %c0_i32, %c0_i32_0 : i32, i32
  }
  func.func @transform_3(%arg0: i32) -> (i32, i32) {
    %c0_i32 = arith.constant 0 : i32
    %c0_i32_0 = arith.constant 0 : i32
    %c0_i32_1 = arith.constant 0 : i32
    return %c0_i32, %c0_i32_0 : i32, i32
  }
  func.func @transform_4(%arg0: i32) -> (i32, i32) {
    %c0_i32 = arith.constant 0 : i32
    %c0_i32_0 = arith.constant 0 : i32
    %c0_i32_1 = arith.constant 0 : i32
    return %c0_i32, %c0_i32_0 : i32, i32
  }
  func.func @transform_5(%arg0: i32) -> (i32, i32) {
    %c0_i32 = arith.constant 0 : i32
    %c0_i32_0 = arith.constant 0 : i32
    %c0_i32_1 = arith.constant 0 : i32
    return %c0_i32, %c0_i32_0 : i32, i32
  }
  func.func @transform_6(%arg0: i32) -> (i32, i32) {
    %c0_i32 = arith.constant 0 : i32
    %c0_i32_0 = arith.constant 0 : i32
    %c0_i32_1 = arith.constant 0 : i32
    return %c0_i32, %c0_i32_0 : i32, i32
  }
  func.func @transform_7(%arg0: i32) -> (i32, i32) {
    %c0_i32 = arith.constant 0 : i32
    %c0_i32_0 = arith.constant 0 : i32
    %c0_i32_1 = arith.constant 0 : i32
    return %c0_i32, %c0_i32_0 : i32, i32
  }
  func.func @transform_8(%arg0: i32) -> (i32, i32) {
    %c0_i32 = arith.constant 0 : i32
    %c0_i32_0 = arith.constant 0 : i32
    return %arg0, %c0_i32 : i32, i32
  }
}

</mosaic_0001>

<bundles_post_ra>
// kernel: tpu_custom_call.1
= control target key start
LH: loop header
LB: loop body
LE: loop exit
PB: predicated region body
PF: predicated region fallthrough
CT: control target
= control target key end

     0   :  { %13 = vsyncpa [#allocation3], 0  ;;  %s1208_s0 = inlined_call_operand.hbm [shape: f32[8,32], index: 0, kind: input, shape index: {}]   ;;  %s1209_s1 = inlined_call_operand.hbm [shape: f32[8,128], index: 1, kind: input, shape index: {}]   ;;  %s1210_s2 = inlined_call_operand.hbm [shape: bf16[32,256], index: 2, kind: input, shape index: {}]   ;;  %s1211_s3 = inlined_call_operand.vmem [shape: f32[1,256], index: 3, kind: input, shape index: {}]   ;;  %s1212_s4 = inlined_call_operand.hbm [shape: bf16[256,256], index: 4, kind: input, shape index: {}]   ;;  %s1213_s5 = inlined_call_operand.vmem [shape: f32[1,256], index: 5, kind: input, shape index: {}]   ;;  %s1214_s6 = inlined_call_operand.hbm [shape: bf16[256,256], index: 6, kind: input, shape index: {}]   ;;  %s1215_s7 = inlined_call_operand.vmem [shape: f32[1,256], index: 7, kind: input, shape index: {}]   ;;  %s1216_s8 = inlined_call_operand.hbm [shape: f32[8,128], index: 8, kind: output, shape index: {}]  }
   0x1   :  { %14 = vsyncpa [#allocation6], 0 }
   0x2   :  { %15 = vsyncpa [#allocation9], 0 }
   0x3   :  { %16 = vsyncpa [#allocation4], 0  ;;  %s1062_s27 = smov [#allocation5]   ;;  %s922_s9 = scalar_lea.hbm %s1209_s1, 128 }
   0x4   :  { %s33_s28 = sshll.u32 %s1062_s27, 4  ;;  %p923_p0 = scmp.ne.s32.totalorder %s1209_s1, %s922_s9  ;;  %s34_s28 = int_to_ptr.vmem [resolvable:$true] %s33_s28 }
   0x5   :  { %p926_p1 = scmp.lt.u32.totalorder %s922_s9, %s1209_s1 }
   0x7   :  { %p928_p2 = pnand %p926_p1, %p923_p0 }
   0x9   :  { %931 = shalt.err (!%p928_p2)
}
   0xa   :  { %s932_s14 = scalar_lea.vmem %s34_s28, 128  ;;  %p937_p4 = scmp.lt.s32.totalorder %s34_s28, %s34_s28 }
   0xb   :  { %p933_p3 = scmp.ne.s32.totalorder %s34_s28, %s932_s14  ;;  %p938_p5 = scmp.lt.s32.totalorder %s932_s14, %s932_s14 }
   0xd   :  { %p939_p6 = por %p938_p5, %p937_p4 }
   0xf   :  { %p940_p7 = pnand %p939_p6, %p933_p3 }
  0x11   :  { %943 = shalt.err (!%p940_p7)
}
  0x12   :  { %36 = dma.hbm_to_vmem [thread:$0]  %s1209_s1, 128, %s34_s28, [#allocation6]  }
  0x13   :  { %s1063_s17 = smov [#allocation8]   ;;  %s1064_s19 = smov [#allocation2]  }
  0x14   :  { %s56_s18 = sshll.u32 %s1063_s17, 4  ;;  %s23_s20 = sshll.u32 %s1064_s19, 4  ;;  %s57_s18 = int_to_ptr.vmem [resolvable:$true] %s56_s18  ;;  %s24_s20 = int_to_ptr.vmem [resolvable:$true] %s23_s20 }
  0x15   :  { %s944_s23 = scalar_lea.hbm %s1212_s4, 4096 }
  0x16   :  { %p945_p8 = scmp.ne.s32.totalorder %s1212_s4, %s944_s23  ;;  %p948_p9 = scmp.lt.u32.totalorder %s944_s23, %s1212_s4 }
  0x18   :  { %p950_p10 = pnand %p948_p9, %p945_p8 }
  0x1a   :  { %953 = shalt.err (!%p950_p10)
}
  0x1b   :  { %s954_s1 = scalar_lea.vmem %s57_s18, 4096  ;;  %p959_p12 = scmp.lt.s32.totalorder %s57_s18, %s57_s18 }
  0x1c   :  { %p955_p11 = scmp.ne.s32.totalorder %s57_s18, %s954_s1  ;;  %p960_p13 = scmp.lt.s32.totalorder %s954_s1, %s954_s1 }
  0x1e   :  { %p961_p0 = por %p960_p13, %p959_p12 }
  0x20   :  { %p962_p1 = pnand %p961_p0, %p955_p11 }
  0x22   :  { %965 = shalt.err (!%p962_p1)
}
  0x23   :  { %s1065_s28 = smov 128   ;;  %s1066_s29 = smov 8  }
  0x24   :  { %62 = dma.hbm_to_vmem [thread:$0]  %s1212_s4, 4096, %s57_s18, [#allocation9], %s1065_s28, %s1065_s28, %s1066_s29  }
  0x25   :  { %s966_s12 = scalar_lea.hbm %s1208_s0, 128 }
  0x26   :  { %p967_p2 = scmp.ne.s32.totalorder %s1208_s0, %s966_s12  ;;  %p970_p3 = scmp.lt.u32.totalorder %s966_s12, %s1208_s0 }
  0x28   :  { %p972_p4 = pnand %p970_p3, %p967_p2 }
  0x2a   :  { %975 = shalt.err (!%p972_p4)
}
  0x2b   :  { %s976_s17 = scalar_lea.vmem %s24_s20, 128  ;;  %p981_p6 = scmp.lt.s32.totalorder %s24_s20, %s24_s20 }
  0x2c   :  { %p977_p5 = scmp.ne.s32.totalorder %s24_s20, %s976_s17  ;;  %p982_p7 = scmp.lt.s32.totalorder %s976_s17, %s976_s17 }
  0x2e   :  { %p983_p8 = por %p982_p7, %p981_p6 }
  0x30   :  { %p984_p9 = pnand %p983_p8, %p977_p5 }
  0x32   :  { %987 = shalt.err (!%p984_p9)
}
  0x33   :  { %26 = dma.hbm_to_vmem [thread:$0]  %s1208_s0, 128, %s24_s20, [#allocation3]  }
  0x34   :  { %s1067_s19 = smov [#allocation7]   ;;  %s1068_s22 = smov [#allocation10]  }
  0x35   :  { %s42_s21 = sshll.u32 %s1067_s19, 4  ;;  %s70_s23 = sshll.u32 %s1068_s22, 4  ;;  %s43_s21 = int_to_ptr.vmem [resolvable:$true] %s42_s21  ;;  %s71_s23 = int_to_ptr.vmem [resolvable:$true] %s70_s23 }
  0x36   :  { %s988_s26 = scalar_lea.hbm %s1210_s2, 512 }
  0x37   :  { %p989_p10 = scmp.ne.s32.totalorder %s1210_s2, %s988_s26  ;;  %p992_p11 = scmp.lt.u32.totalorder %s988_s26, %s1210_s2 }
  0x39   :  { %p994_p12 = pnand %p992_p11, %p989_p10 }
  0x3b   :  { %997 = shalt.err (!%p994_p12)
}
  0x3c   :  { %s998_s0 = scalar_lea.vmem %s43_s21, 512  ;;  %p1003_p0 = scmp.lt.s32.totalorder %s43_s21, %s43_s21 }
  0x3d   :  { %p999_p13 = scmp.ne.s32.totalorder %s43_s21, %s998_s0  ;;  %p1004_p1 = scmp.lt.s32.totalorder %s998_s0, %s998_s0 }
  0x3f   :  { %p1005_p2 = por %p1004_p1, %p1003_p0 }
  0x41   :  { %p1006_p3 = pnand %p1005_p2, %p999_p13 }
  0x43   :  { %1009 = shalt.err (!%p1006_p3)
}
  0x44   :  { %48 = dma.hbm_to_vmem [thread:$0]  %s1210_s2, 512, %s43_s21, [#allocation6], %s1065_s28, %s1065_s28, %s1066_s29  }
  0x45   :  { %s1010_s13 = scalar_lea.hbm %s1214_s6, 4096 }
  0x46   :  { %p1011_p4 = scmp.ne.s32.totalorder %s1214_s6, %s1010_s13  ;;  %p1014_p5 = scmp.lt.u32.totalorder %s1010_s13, %s1214_s6 }
  0x48   :  { %p1016_p6 = pnand %p1014_p5, %p1011_p4 }
  0x4a   :  { %1019 = shalt.err (!%p1016_p6)
}
  0x4b   :  { %s1020_s4 = scalar_lea.vmem %s71_s23, 4096  ;;  %p1025_p8 = scmp.lt.s32.totalorder %s71_s23, %s71_s23 }
  0x4c   :  { %p1021_p7 = scmp.ne.s32.totalorder %s71_s23, %s1020_s4  ;;  %p1026_p9 = scmp.lt.s32.totalorder %s1020_s4, %s1020_s4 }
  0x4e   :  { %p1027_p10 = por %p1026_p9, %p1025_p8 }
  0x50   :  { %p1028_p11 = pnand %p1027_p10, %p1021_p7 }
  0x52   :  { %1031 = shalt.err (!%p1028_p11)
}
  0x53   :  { %76 = dma.hbm_to_vmem [thread:$0]  %s1214_s6, 4096, %s71_s23, [#allocation9], %s1065_s28, %s1065_s28, %s1066_s29  }
  0x54   :  { %1054 = dma.done.wait [#allocation3], 128  }
  0x55   :  { %1055 = vsyncadd [#allocation3], 4294967168 }
  0x56   :  { %1056 = dma.done.wait [#allocation6], 640  }
  0x57   :  { %1057 = vsyncadd [#allocation6], 4294966656 }
  0x58   :  { %1058 = dma.done.wait [#allocation9], 8192  }
  0x59   :  { %1059 = vsyncadd [#allocation9], 4294959104  ;;  %v1069_v0 = vmov 0   ;;  %v812_v1 = vld [vmem:[#allocation7 + $0x4] ss:$8 sps:$4 sm:$0xff]   ;;  %v95_v5 = vld [vmem:[#allocation2] sm:$0xff] }
  0x5a   :  { %169 = vmatprep.mubr.bf16.mxu0 %v1069_v0  ;;  %v814_v2 = vld [vmem:[#allocation7] ss:$8 sps:$4 sm:$0xff]   ;;  %137 = vmatprep.subr.bf16.mxu0 %v812_v1  ;;  %v815_v3 = vld [vmem:[#allocation7 + $0x14] ss:$8 sps:$4 sm:$0xff]   ;;  %v817_v4 = vld [vmem:[#allocation7 + $0x10] ss:$8 sps:$4 sm:$0xff]   ;;  %v96_v9 = vpack.c.bf16 %v95_v5, %v95_v5 }
  0x5b   :  { %138 = vmatpush1.bf16.msra.mxu0 %v814_v2  ;;  %v818_v6 = vld [vmem:[#allocation8 + $0x4] ss:$8 sps:$4 sm:$0xff]   ;;  %v820_v7 = vld [vmem:[#allocation8] ss:$8 sps:$4 sm:$0xff]   ;;  %v821_v8 = vld [vmem:[#allocation8 + $0x14] ss:$8 sps:$4 sm:$0xff]  }
  0x5c   :  { %139 = vmatprep.subr.bf16.mxu0 %v815_v3  ;;  %386 = vmatprep.subr.bf16.mxu1 %v818_v6  ;;  %v823_v10 = vld [vmem:[#allocation8 + $0x10] ss:$8 sps:$4 sm:$0xff]   ;;  %vm133_vm0 = vcmask 261120   ;;  %v824_v11 = vld [vmem:[#allocation8 + $0x24] ss:$8 sps:$4 sm:$0xff]   ;;  %v103_v3 = vlaneseq }
  0x5d   :  { %387 = vmatpush1.bf16.msra.mxu1 %v820_v7  ;;  %v826_v12 = vld [vmem:[#allocation8 + $0x20] ss:$8 sps:$4 sm:$0xff]   ;;  %v827_v13 = vld [vmem:[#allocation8 + $0x34] ss:$8 sps:$4 sm:$0xff]   ;;  %v829_v14 = vld [vmem:[#allocation8 + $0x30] ss:$8 sps:$4 sm:$0xff]  }
  0x5e   :  { %388 = vmatprep.subr.bf16.mxu1 %v821_v8  ;;  %v830_v15 = vld [vmem:[#allocation8 + $0x44] ss:$8 sps:$4 sm:$0xff]   ;;  %v832_v16 = vld [vmem:[#allocation8 + $0x40] ss:$8 sps:$4 sm:$0xff]   ;;  %v833_v17 = vld [vmem:[#allocation8 + $0x54] ss:$8 sps:$4 sm:$0xff]  }
  0x5f   :  { %140 = vmatpush1.bf16.msra.mxu0 %v817_v4  ;;  %v835_v18 = vld [vmem:[#allocation8 + $0x50] ss:$8 sps:$4 sm:$0xff]   ;;  %v836_v19 = vld [vmem:[#allocation8 + $0x64] ss:$8 sps:$4 sm:$0xff]   ;;  %v838_v20 = vld [vmem:[#allocation8 + $0x60] ss:$8 sps:$4 sm:$0xff]  }
  0x60   :  { %v839_v21 = vld [vmem:[#allocation8 + $0x74] ss:$8 sps:$4 sm:$0xff]   ;;  %v841_v22 = vld [vmem:[#allocation8 + $0x70] ss:$8 sps:$4 sm:$0xff]   ;;  %v842_v23 = vld [vmem:[#allocation8 + $0x84] ss:$8 sps:$4 sm:$0xff]  }
  0x61   :  { %389 = vmatpush1.bf16.msra.mxu1 %v823_v10  ;;  %v844_v24 = vld [vmem:[#allocation8 + $0x80] ss:$8 sps:$4 sm:$0xff]   ;;  %v845_v25 = vld [vmem:[#allocation8 + $0x94] ss:$8 sps:$4 sm:$0xff]   ;;  %v847_v26 = vld [vmem:[#allocation8 + $0x90] ss:$8 sps:$4 sm:$0xff]  }
  0x62   :  { %737 = vmatmul.mubr.msk.bf16.vlgmr.msra.gmra.mrb[0].mxu0 %vm133_vm0, %v96_v9  ;;  %390 = vmatprep.subr.bf16.mxu1 %v824_v11  ;;  %v848_v27 = vld [vmem:[#allocation8 + $0xa4] ss:$8 sps:$4 sm:$0xff]   ;;  %v850_v28 = vld [vmem:[#allocation8 + $0xa0] ss:$8 sps:$4 sm:$0xff]   ;;  %v851_v29 = vld [vmem:[#allocation8 + $0xb4] ss:$8 sps:$4 sm:$0xff]  }
  0x63   :  { %v853_v30 = vld [vmem:[#allocation8 + $0xb0] ss:$8 sps:$4 sm:$0xff]   ;;  %v854_v31 = vld [vmem:[#allocation8 + $0xc4] ss:$8 sps:$4 sm:$0xff]   ;;  %v856_v32 = vld [vmem:[#allocation8 + $0xc0] ss:$8 sps:$4 sm:$0xff]  }
  0x64   :  { %v857_v33 = vld [vmem:[#allocation8 + $0xd4] ss:$8 sps:$4 sm:$0xff]   ;;  %v859_v34 = vld [vmem:[#allocation8 + $0xd0] ss:$8 sps:$4 sm:$0xff]   ;;  %v860_v35 = vld [vmem:[#allocation8 + $0xe4] ss:$8 sps:$4 sm:$0xff]  }
  0x65   :  { %391 = vmatpush1.bf16.msra.mxu1 %v826_v12  ;;  %v862_v36 = vld [vmem:[#allocation8 + $0xe0] ss:$8 sps:$4 sm:$0xff]   ;;  %v863_v37 = vld [vmem:[#allocation8 + $0xf4] ss:$8 sps:$4 sm:$0xff]   ;;  %v865_v38 = vld [vmem:[#allocation8 + $0xf0] ss:$8 sps:$4 sm:$0xff]  }
  0x66   :  { %392 = vmatprep.subr.bf16.mxu1 %v827_v13  ;;  %v866_v39 = vld [vmem:[#allocation10] ss:$8 sps:$4 sm:$0xff]   ;;  %v868_v40 = vld [vmem:[#allocation10 + $0x4] ss:$8 sps:$4 sm:$0xff]   ;;  %v871_v41 = vld [vmem:[#allocation10 + $0x14] ss:$8 sps:$4 sm:$0xff]  }
  0x67   :  { %635 = vmatprep.subr.bf16.mxu0 %v868_v40  ;;  %v869_v42 = vld [vmem:[#allocation10 + $0x10] ss:$8 sps:$4 sm:$0xff]   ;;  %v874_v43 = vld [vmem:[#allocation10 + $0x24] ss:$8 sps:$4 sm:$0xff]   ;;  %v872_v44 = vld [vmem:[#allocation10 + $0x20] ss:$8 sps:$4 sm:$0xff]  }
  0x68   :  { %636 = vmatpush1.bf16.msra.mxu0 %v866_v39  ;;  %v877_v45 = vld [vmem:[#allocation10 + $0x34] ss:$8 sps:$4 sm:$0xff]   ;;  %v875_v46 = vld [vmem:[#allocation10 + $0x30] ss:$8 sps:$4 sm:$0xff]   ;;  %v880_v47 = vld [vmem:[#allocation10 + $0x44] ss:$8 sps:$4 sm:$0xff]  }
  0x69   :  { %393 = vmatpush1.bf16.msra.mxu1 %v829_v14  ;;  %637 = vmatprep.subr.bf16.mxu0 %v871_v41  ;;  %v878_v48 = vld [vmem:[#allocation10 + $0x40] ss:$8 sps:$4 sm:$0xff]   ;;  %v883_v49 = vld [vmem:[#allocation10 + $0x54] ss:$8 sps:$4 sm:$0xff]   ;;  %v881_v50 = vld [vmem:[#allocation10 + $0x50] ss:$8 sps:$4 sm:$0xff]  }
  0x6a   :  { %394 = vmatprep.subr.bf16.mxu1 %v830_v15  ;;  %v886_v51 = vld [vmem:[#allocation10 + $0x64] ss:$8 sps:$4 sm:$0xff]   ;;  %v884_v52 = vld [vmem:[#allocation10 + $0x60] ss:$8 sps:$4 sm:$0xff]   ;;  %v889_v53 = vld [vmem:[#allocation10 + $0x74] ss:$8 sps:$4 sm:$0xff]  }
  0x6b   :  { %v887_v54 = vld [vmem:[#allocation10 + $0x70] ss:$8 sps:$4 sm:$0xff]   ;;  %v892_v55 = vld [vmem:[#allocation10 + $0x84] ss:$8 sps:$4 sm:$0xff]   ;;  %v890_v56 = vld [vmem:[#allocation10 + $0x80] ss:$8 sps:$4 sm:$0xff]  }
  0x6c   :  { %638 = vmatpush1.bf16.msra.mxu0 %v869_v42  ;;  %v895_v57 = vld [vmem:[#allocation10 + $0x94] ss:$8 sps:$4 sm:$0xff]   ;;  %v893_v58 = vld [vmem:[#allocation10 + $0x90] ss:$8 sps:$4 sm:$0xff]   ;;  %v898_v59 = vld [vmem:[#allocation10 + $0xa4] ss:$8 sps:$4 sm:$0xff]  }
  0x6d   :  { %395 = vmatpush1.bf16.msra.mxu1 %v832_v16  ;;  %639 = vmatprep.subr.bf16.mxu0 %v874_v43  ;;  %v896_v60 = vld [vmem:[#allocation10 + $0xa0] ss:$8 sps:$4 sm:$0xff]   ;;  %v901_v61 = vld [vmem:[#allocation10 + $0xb4] ss:$8 sps:$4 sm:$0xff]   ;;  %v899_v62 = vld [vmem:[#allocation10 + $0xb0] ss:$8 sps:$4 sm:$0xff]  }
  0x6e   :  { %396 = vmatprep.subr.bf16.mxu1 %v833_v17  ;;  %v904_v63 = vld [vmem:[#allocation10 + $0xc4] ss:$8 sps:$4 sm:$0xff]   ;;  %v902_v0 = vld [vmem:[#allocation10 + $0xc0] ss:$8 sps:$4 sm:$0xff]   ;;  %v907_v1 = vld [vmem:[#allocation10 + $0xd4] ss:$8 sps:$4 sm:$0xff]  }
  0x6f   :  { %v905_v2 = vld [vmem:[#allocation10 + $0xd0] ss:$8 sps:$4 sm:$0xff]   ;;  %v104_v4 = vshrl.u32 %v103_v3, 7 }
  0x70   :  { %640 = vmatpush1.bf16.msra.mxu0 %v872_v44  ;;  %v101_v6 = vld [vmem:[%s1211_s3] sm:$0x3] }
  0x71   :  { %397 = vmatpush1.bf16.msra.mxu1 %v835_v18  ;;  %641 = vmatprep.subr.bf16.mxu0 %v877_v45  ;;  %v105_v5 = vsub.s32 0, %v104_v4  ;;  %v109_v7 = vsub.s32 1, %v104_v4 }
  0x72   :  { %398 = vmatprep.subr.bf16.mxu1 %v836_v19 }
  0x73   :  { %v106_v8 = vrot.slane %v101_v6, %v105_v5  ;;  %v110_v9 = vrot.slane %v101_v6, %v109_v7 }
  0x74   :  { %642 = vmatpush1.bf16.msra.mxu0 %v875_v46 }
  0x75   :  { %399 = vmatpush1.bf16.msra.mxu1 %v838_v20  ;;  %643 = vmatprep.subr.bf16.mxu0 %v880_v47  ;;  %v910_v20 = vld [vmem:[#allocation10 + $0xe4] ss:$8 sps:$4 sm:$0xff]  }
  0x76   :  { %400 = vmatprep.subr.bf16.mxu1 %v839_v21  ;;  %v908_v21 = vld [vmem:[#allocation10 + $0xe0] ss:$8 sps:$4 sm:$0xff]  }
  0x78   :  { %644 = vmatpush1.bf16.msra.mxu0 %v878_v48 }
  0x79   :  { %401 = vmatpush1.bf16.msra.mxu1 %v841_v22  ;;  %645 = vmatprep.subr.bf16.mxu0 %v883_v49  ;;  %v913_v22 = vld [vmem:[#allocation10 + $0xf4] ss:$8 sps:$4 sm:$0xff]  }
  0x7a   :  { %402 = vmatprep.subr.bf16.mxu1 %v842_v23  ;;  %v911_v23 = vld [vmem:[#allocation10 + $0xf0] ss:$8 sps:$4 sm:$0xff]  }
  0x7b   :  { %v680_v49 = vld [vmem:[#allocation5] sm:$0xff] }
  0x7c   :  { %646 = vmatpush1.bf16.msra.mxu0 %v881_v50 }
  0x7d   :  { %403 = vmatpush1.bf16.msra.mxu1 %v844_v24  ;;  %647 = vmatprep.subr.bf16.mxu0 %v886_v51  ;;  %v214_v24 = vld [vmem:[%s1213_s5] sm:$0x3]  ;;  %s1070_s5 = smov [#allocation11]  }
  0x7e   :  { %404 = vmatprep.subr.bf16.mxu1 %v845_v25  ;;  %v219_v25 = vrot.slane %v214_v24, %v105_v5 }
  0x80   :  { %648 = vmatpush1.bf16.msra.mxu0 %v884_v52 }
  0x81   :  { %405 = vmatpush1.bf16.msra.mxu1 %v847_v26  ;;  %649 = vmatprep.subr.bf16.mxu0 %v889_v53  ;;  %v223_v26 = vrot.slane %v214_v24, %v109_v7 }
  0x82   :  { %406 = vmatprep.subr.bf16.mxu1 %v848_v27 }
  0x84   :  { %650 = vmatpush1.bf16.msra.mxu0 %v887_v54 }
  0x85   :  { %407 = vmatpush1.bf16.msra.mxu1 %v850_v28  ;;  %651 = vmatprep.subr.bf16.mxu0 %v892_v55 }
  0x86   :  { %408 = vmatprep.subr.bf16.mxu1 %v851_v29 }
  0x88   :  { %652 = vmatpush1.bf16.msra.mxu0 %v890_v56 }
  0x89   :  { %409 = vmatpush1.bf16.msra.mxu1 %v853_v30  ;;  %653 = vmatprep.subr.bf16.mxu0 %v895_v57 }
  0x8a   :  { %410 = vmatprep.subr.bf16.mxu1 %v854_v31 }
  0x8c   :  { %654 = vmatpush1.bf16.msra.mxu0 %v893_v58 }
  0x8d   :  { %411 = vmatpush1.bf16.msra.mxu1 %v856_v32  ;;  %655 = vmatprep.subr.bf16.mxu0 %v898_v59 }
  0x8e   :  { %412 = vmatprep.subr.bf16.mxu1 %v857_v33 }
  0x90   :  { %656 = vmatpush1.bf16.msra.mxu0 %v896_v60  ;;  %v684_v60 = vmul.f32 -0.5, %v680_v49 }
  0x91   :  { %413 = vmatpush1.bf16.msra.mxu1 %v859_v34  ;;  %657 = vmatprep.subr.bf16.mxu0 %v901_v61 }
  0x92   :  { %414 = vmatprep.subr.bf16.mxu1 %v860_v35 }
  0x94   :  { %658 = vmatpush1.bf16.msra.mxu0 %v899_v62 }
  0x95   :  { %415 = vmatpush1.bf16.msra.mxu1 %v862_v36  ;;  %659 = vmatprep.subr.bf16.mxu0 %v904_v63 }
  0x96   :  { %416 = vmatprep.subr.bf16.mxu1 %v863_v37  ;;  %v463_v37 = vld [vmem:[%s1215_s7] sm:$0x3]  ;;  %s722_s7 = sshll.u32 %s1070_s5, 4  ;;  %s723_s7 = int_to_ptr.vmem [resolvable:$true] %s722_s7 }
  0x97   :  { %v468_v47 = vrot.slane %v463_v37, %v105_v5  ;;  %s1032_s22 = scalar_lea.vmem %s723_s7, 128  ;;  %p1037_p13 = scmp.lt.s32.totalorder %s723_s7, %s723_s7 }
  0x98   :  { %660 = vmatpush1.bf16.msra.mxu0 %v902_v0  ;;  %v685_v0 = vmul.f32 %v684_v60, %v680_v49  ;;  %p1033_p12 = scmp.ne.s32.totalorder %s723_s7, %s1032_s22  ;;  %p1038_p0 = scmp.lt.s32.totalorder %s1032_s22, %s1032_s22 }
  0x99   :  { %417 = vmatpush1.bf16.msra.mxu1 %v865_v38  ;;  %661 = vmatprep.subr.bf16.mxu0 %v907_v1  ;;  %v472_v38 = vrot.slane %v463_v37, %v109_v7 }
  0x9a   :  { %p1039_p1 = por %p1038_p0, %p1037_p13 }
  0x9c   :  { %662 = vmatpush1.bf16.msra.mxu0 %v905_v2  ;;  %p1040_p2 = pnand %p1039_p1, %p1033_p12 }
  0x9d   :  { %663 = vmatprep.subr.bf16.mxu0 %v910_v20 }
  0xa0   :  { %664 = vmatpush1.bf16.msra.mxu0 %v908_v21 }
  0xa1   :  { %665 = vmatprep.subr.bf16.mxu0 %v913_v22 }
  0xa4   :  { %666 = vmatpush1.bf16.msra.mxu0 %v911_v23 }
 0x135   :  { %v171_v10 = vpop.f32.mrb[0].mxu0 }
 0x136   :  { %v172_v11 = vadd.f32 %v171_v10, %v106_v8  ;;  %v173_v12 = vpop.f32.mrb[1].mxu0 }
 0x137   :  { %v174_v13 = vadd.f32 %v173_v12, %v110_v9  ;;  %v175_v14 = vpop.f32.mrb[2].mxu0  ;;  %v709_v9 = vand.u32 127, %v103_v3 }
 0x138   :  { %v178_v15 = vmax.f32 %v172_v11, 0.0  ;;  %v176_v16 = vpop.f32.mrb[3].mxu0 }
 0x139   :  { %v179_v17 = vmax.f32 %v174_v13, 0.0  ;;  %vm710_vm2 = vcmp.lt.s32.totalorder %v709_v9, 8 }
 0x13a   :  { %v180_v19 = vpack.c.bf16 %v178_v15, %v178_v15 }
 0x13b   :  { %v181_v18 = vpack.c.bf16 %v179_v17, %v179_v17 }
 0x13d   :  { %418 = vmatprep.mubr.bf16.mxu1 %v181_v18 }
 0x13e   :  { %419 = vmatmul.mubr.bf16.vlgmr.msra.gmra.mrb[0].mxu1 %v180_v19 }
 0x211   :  { %v420_v27 = vpop.f32.mrb[0].mxu1 }
 0x212   :  { %v421_v28 = vadd.f32 %v420_v27, %v219_v25  ;;  %v422_v29 = vpop.f32.mrb[1].mxu1 }
 0x213   :  { %v423_v30 = vadd.f32 %v422_v29, %v223_v26  ;;  %v424_v31 = vpop.f32.mrb[2].mxu1 }
 0x214   :  { %v427_v32 = vmax.f32 %v421_v28, 0.0  ;;  %v425_v33 = vpop.f32.mrb[3].mxu1 }
 0x215   :  { %v428_v34 = vmax.f32 %v423_v30, 0.0 }
 0x216   :  { %v429_v36 = vpack.c.bf16 %v427_v32, %v427_v32 }
 0x217   :  { %v430_v35 = vpack.c.bf16 %v428_v34, %v428_v34 }
 0x219   :  { %667 = vmatprep.mubr.bf16.mxu0 %v430_v35 }
 0x21a   :  { %668 = vmatmul.mubr.bf16.vlgmr.msra.gmra.mrb[4].mxu0 %v429_v36 }
 0x2ed   :  { %v669_v39 = vpop.f32.mrb[4].mxu0 }
 0x2ee   :  { %v671_v40 = vpop.f32.mrb[5].mxu0  ;;  %v670_v50 = vadd.f32 %v669_v39, %v468_v47 }
 0x2ef   :  { %v672_v41 = vadd.f32 %v671_v40, %v472_v38  ;;  %v673_v42 = vpop.f32.mrb[6].mxu0 }
 0x2f0   :  { %v674_v43 = vpop.f32.mrb[7].mxu0 }
 0x2f1   :  { %v676_v44 = vmax.f32 %v672_v41, -20.0 }
 0x2f3   :  { %v677_v45 = vmin.f32 %v676_v44, 2.0 }
 0x2f5   :  { %v678_v46 = vmul.f32 1.442695, %v677_v45  ;;  %v686_v6 = vsub.f32 %v685_v0, %v677_v45 }
 0x2f7   :  { %914 = vpow2.f32 %v678_v46  ;;  %v802_v11 = vadd.f32 -0.9189385, %v686_v6 }
 0x301   :  { %v915_v48 = vpop.eup %914 }
 0x302   :  { %v681_v51 = vmul.f32 %v915_v48, %v680_v49 }
 0x304   :  { %v682_v52 = vadd.f32 %v681_v51, %v670_v50 }
 0x306   :  { %v688_v53 = vmul.f32 -2.0, %v682_v52  ;;  %v704_v8 = vsub.f32 0.6931472, %v682_v52 }
 0x308   :  { %v690_v54 = vand.u32 2147483647, %v688_v53  ;;  %v689_v4 = vmax.f32 %v688_v53, 0.0 }
 0x30a   :  { %v691_v55 = vsub.f32 0.0, %v690_v54 }
 0x30c   :  { %v692_v56 = vmul.f32 1.442695, %v691_v55 }
 0x30e   :  { %916 = vpow2.f32 %v692_v56 }
 0x318   :  { %v917_v57 = vpop.eup %916 }
 0x319   :  { %v694_v58 = vadd.f32 1.0, %v917_v57  ;;  %v697_v59 = vmul.f32 -0.5, %v917_v57  ;;  %v700_v62 = vand.u32 2147483647, %v917_v57 }
 0x31b   :  { %918 = vlog2.f32 %v694_v58  ;;  %v698_v61 = vadd.f32 1.0, %v697_v59  ;;  %vm701_vm1 = vcmp.lt.f32.partialorder %v700_v62, 0.0004427343 }
 0x31c   :  { %920 = vtanh.f32 %v682_v52 }
 0x31d   :  { %v699_v2 = vmul.f32 %v917_v57, %v698_v61 }
 0x325   :  { %v919_v63 = vpop.eup %918 }
 0x326   :  { %v696_v1 = vmul.f32 0.6931472, %v919_v63  ;;  %v921_v15 = vpop.eup %920 }
 0x328   :  { %v702_v5 = vsel %vm701_vm1, %v699_v2, %v696_v1 }
 0x329   :  { %v703_v7 = vadd.f32 %v702_v5, %v689_v4 }
 0x32b   :  { %v705_v10 = vsub.f32 %v704_v8, %v703_v7 }
 0x32d   :  { %v706_v12 = vmul.f32 2.0, %v705_v10 }
 0x32f   :  { %v707_v13 = vsub.f32 %v802_v11, %v706_v12 }
 0x331   :  { %v711_v14 = vsel %vm710_vm2, %v707_v13, 0.0 }
 0x332   :  { %712 = vadd.xlane.f32.xlu0 %v711_v14 }
 0x3bf   :  { %v713_v16 = vpop.xlane.xlu0 %712 }
 0x3c0   :  { %v714_v17 = vsel %vm710_vm2, %v921_v15, %v713_v16 }
 0x3c1   :  { %715 = vst [vmem:[#allocation11] sm:$0xff] %v714_v17 }
 0x3c2   :  { %1043 = shalt.err (!%p1040_p2)
}
 0x3c3   :  { %s1044_s25 = scalar_lea.hbm %s1216_s8, 128 }
 0x3c4   :  { %p1045_p3 = scmp.ne.s32.totalorder %s1216_s8, %s1044_s25  ;;  %p1048_p4 = scmp.lt.u32.totalorder %s1044_s25, %s1216_s8 }
 0x3c6   :  { %p1050_p5 = pnand %p1048_p4, %p1045_p3 }
 0x3c8   :  { %1053 = shalt.err (!%p1050_p5)
}
 0x3c9   :  { %725 = dma.vmem_to_hbm [thread:$0]  %s723_s7, 128, %s1216_s8, [#allocation4]  }
 0x3ca   :  { %1060 = dma.done.wait [#allocation4], 128  }
 0x3cb   :  { %1061 = vsyncadd [#allocation4], 4294967168 }
 0x3cc   :  { %729 = vsyncpa [#allocation3], 1 }
 0x3cd   :  { %730 = vsyncpa [#allocation6], 1 }
 0x3ce   :  { %731 = vsyncpa [#allocation9], 1 }
 0x3cf   :  { %732 = vsyncpa [#allocation4], 1 }

</bundles_post_ra>
